<compile_context>
chip_gen: v7x
topology: tpu7x:2x2x1
jax: 0.10.0
libtpu: 0.0.40
codegen_flags: <defaults>
</compile_context>

<pallas_src>
import jax
import jax.numpy as jnp
from jax.experimental import pallas as pl
from jax.experimental.pallas import tpu as pltpu

_TARGET_TILE_BYTES = 4 << 20        # ~4 MiB per tile (per input)
_SMALL_UNALIGNED_LIMIT = 1 << 18    # single-block fallback threshold (elements)


def _scale_kernel(scale_ref, x_ref, o_ref):
    # scale_ref: (1,) f32 in SMEM; x_ref/o_ref: (tile_r, cols) in VMEM.
    # Compute in f32, cast only on the store (safe for bf16/fp8 inputs).
    s = scale_ref[0]
    o_ref[...] = (x_ref[...].astype(jnp.float32) * s).astype(o_ref.dtype)


def scale_forward(x, scale):
    """Elementwise y = x * scale for any-rank x; `scale` is a scalar param."""
    orig_shape = x.shape
    dtype = x.dtype
    total = int(x.size)
    if total == 0:
        return x

    itemsize = jnp.dtype(dtype).itemsize
    scale_arr = jnp.asarray(scale, dtype=jnp.float32).reshape((1,))
    flat = x.reshape(-1)

    padded_total = total
    if total % 128 == 0:
        # Hot path: no padding. Largest lane-dense cols dividing total.
        cols = next(c for c in (1024, 512, 256, 128) if total % c == 0)
    elif total <= _SMALL_UNALIGNED_LIMIT:
        # Small unaligned input: one full block (block shape == array shape,
        # so the (8,128) divisibility rule does not apply). No padding.
        cols = total
    else:
        # Rare path: large unaligned input. Pad the tail to a multiple of 128
        # (at most 127 elements), slice back afterwards.
        padded_total = -(-total // 128) * 128
        flat = jnp.pad(flat, (0, padded_total - total))
        cols = 128

    rows = padded_total // cols
    x2d = flat.reshape(rows, cols)

    # Dtype-aware tile rows targeting ~_TARGET_TILE_BYTES per tile, rounded
    # down to a multiple of 8 (with a packing-aware floor for narrow dtypes).
    min_rows = max(8, 32 // itemsize)                 # 8 f32, 16 bf16, 32 int8/fp8
    tile_r = (_TARGET_TILE_BYTES // (cols * itemsize) // 8) * 8
    tile_r = max(min_rows, tile_r)
    if tile_r >= rows:
        tile_r = rows                                  # full extent -> exempt from (8,128)

    grid = (pl.cdiv(rows, tile_r),)                    # partial last block is masked

    out2d = pl.pallas_call(
        _scale_kernel,
        out_shape=jax.ShapeDtypeStruct((rows, cols), dtype),
        grid=grid,
        in_specs=[
            pl.BlockSpec(memory_space=pltpu.MemorySpace.SMEM),   # scalar param
            pl.BlockSpec((tile_r, cols), lambda i: (i, 0)),      # input tile
        ],
        out_specs=pl.BlockSpec((tile_r, cols), lambda i: (i, 0)),
        compiler_params=pltpu.CompilerParams(
            dimension_semantics=("parallel",),   # v7x: shard rows across 2 TCs
            vmem_limit_bytes=32 << 20,           # headroom for 4 MiB double-buffered tiles
        ),
        cost_estimate=pl.CostEstimate(
            flops=padded_total,
            transcendentals=0,
            bytes_accessed=2 * padded_total * itemsize + 4,
        ),
    )(scale_arr, x2d)

    out = out2d.reshape(-1)
    if padded_total != total:
        out = out[:total]
    return out.reshape(orig_shape)


if __name__ == "__main__":
    key = jax.random.PRNGKey(0)
    # NCHW input, small shapes (matches the module's typical usage).
    x = jax.random.normal(key, (2, 4, 16, 16), dtype=jnp.float32)

    # Deterministic parameter (module default is 1.0; use 0.5 so the multiply
    # is observable in the correctness check).
    scale_param = jnp.float32(0.5)

    y = scale_forward(x, scale_param)
    y = jax.block_until_ready(y)

    # Reference check
    y_ref = x * scale_param
    assert y.shape == x.shape and y.dtype == x.dtype
    assert jnp.allclose(y, y_ref, atol=1e-6, rtol=1e-6)

    print("KERNEL_OK")
</pallas_src>

<mosaic_0001>
module attributes {stable_mosaic.version = 11 : i64} {
  func.func @_scale_kernel(%arg0: i32, %arg1: memref<1xf32, #tpu.memory_space<smem>>, %arg2: memref<2x1024xf32, #tpu.memory_space<vmem>>, %arg3: memref<2x1024xf32, #tpu.memory_space<vmem>>) attributes {dimension_semantics = [#tpu.dimension_semantics<parallel>], iteration_bounds = array<i64: 1>, scalar_prefetch = 0 : i64, scratch_operands = 0 : i64, tpu.core_type = #tpu.core_type<tc>, window_params = [{transform_indices = @transform_0, window_bounds = array<i64: 1>}, {transform_indices = @transform_1, window_bounds = array<i64: 2, 1024>}, {transform_indices = @transform_2, window_bounds = array<i64: 2, 1024>}]} {
    %c0 = arith.constant 0 : index
    %0 = memref.load %arg1[%c0] : memref<1xf32, #tpu.memory_space<smem>>
    %c0_0 = arith.constant 0 : index
    %c0_1 = arith.constant 0 : index
    %1 = vector.load %arg2[%c0_0, %c0_1] : memref<2x1024xf32, #tpu.memory_space<vmem>>, vector<2x1024xf32>
    %2 = vector.broadcast %0 : f32 to vector<2x1024xf32>
    %3 = arith.mulf %1, %2 : vector<2x1024xf32>
    %c0_2 = arith.constant 0 : index
    %c0_3 = arith.constant 0 : index
    %4 = vector.load %arg3[%c0_2, %c0_3] : memref<2x1024xf32, #tpu.memory_space<vmem>>, vector<2x1024xf32>
    tpu.vector_store %arg3[%c0_2, %c0_3], %3 {strides = array<i32>} : memref<2x1024xf32, #tpu.memory_space<vmem>>, vector<2x1024xf32>,
    return
  }
  func.func @transform_0(%arg0: i32) -> i32 {
    %c0_i32 = arith.constant 0 : i32
    %c0_i32_0 = arith.constant 0 : i32
    return %c0_i32 : i32
  }
  func.func @transform_1(%arg0: i32) -> (i32, i32) {
    %c0_i32 = arith.constant 0 : i32
    %c0_i32_0 = arith.constant 0 : i32
    return %arg0, %c0_i32 : i32, i32
  }
  func.func @transform_2(%arg0: i32) -> (i32, i32) {
    %c0_i32 = arith.constant 0 : i32
    %c0_i32_0 = arith.constant 0 : i32
    return %arg0, %c0_i32 : i32, i32
  }
}

</mosaic_0001>

<bundles_post_ra>
// kernel: tpu_custom_call.1
= control target key start
LH: loop header
LB: loop body
LE: loop exit
PB: predicated region body
PF: predicated region fallthrough
CT: control target
= control target key end

     0   :  { %8 = vsyncpa [#allocation4], 0  ;;  %s142_s0 = inlined_call_operand.<no memory space> [shape: f32[1], index: 0, kind: input, shape index: {}]   ;;  %s143_s1 = inlined_call_operand.hbm [shape: f32[2,1024], index: 1, kind: input, shape index: {}]   ;;  %s144_s2 = inlined_call_operand.hbm [shape: f32[2,1024], index: 2, kind: output, shape index: {}]  }
   0x1   :  { %9 = vsyncpa [#allocation5], 0  ;;  %s98_s9 = smov [#allocation3]   ;;  %s50_s13 = scalar_lea.hbm %s143_s1, 256 }
   0x2   :  { %s18_s10 = sshll.u32 %s98_s9, 4  ;;  %p51_p0 = scmp.ne.s32.totalorder %s143_s1, %s50_s13  ;;  %s19_s10 = int_to_ptr.vmem [resolvable:$true] %s18_s10 }
   0x3   :  { %p54_p1 = scmp.lt.u32.totalorder %s50_s13, %s143_s1 }
   0x5   :  { %p56_p2 = pnand %p54_p1, %p51_p0 }
   0x7   :  { %59 = shalt.err (!%p56_p2)
}
   0x8   :  { %s60_s18 = scalar_lea.vmem %s19_s10, 256  ;;  %p65_p4 = scmp.lt.s32.totalorder %s19_s10, %s19_s10 }
   0x9   :  { %p61_p3 = scmp.ne.s32.totalorder %s19_s10, %s60_s18  ;;  %p66_p5 = scmp.lt.s32.totalorder %s60_s18, %s60_s18 }
   0xb   :  { %p67_p6 = por %p66_p5, %p65_p4 }
   0xd   :  { %p68_p7 = pnand %p67_p6, %p61_p3 }
   0xf   :  { %71 = shalt.err (!%p68_p7)
}
  0x10   :  { %21 = dma.hbm_to_vmem [thread:$0]  %s143_s1, 256, %s19_s10, [#allocation4]  }
  0x11   :  { %94 = dma.done.wait [#allocation4], 256  }
  0x12   :  { %95 = vsyncadd [#allocation4], 4294967040  ;;  %v28_v0 = vstv %s142_s0  ;;  %s99_s23 = smov [#allocation6]   ;;  %v26_v1 = vld [vmem:[#allocation3] sm:$0xff]  ;;  %v27_v2 = vld [vmem:[#allocation3 + $0x8] sm:$0xff] }
  0x13   :  { %s39_s24 = sshll.u32 %s99_s23, 4  ;;  %v29_v3 = vmul.f32 %v28_v0, %v26_v1  ;;  %v30_v4 = vmul.f32 %v28_v0, %v27_v2  ;;  %s40_s24 = int_to_ptr.vmem [resolvable:$true] %s39_s24 }
  0x14   :  { %s72_s25 = scalar_lea.vmem %s40_s24, 256  ;;  %p77_p9 = scmp.lt.s32.totalorder %s40_s24, %s40_s24 }
  0x15   :  { %31 = vst [vmem:[#allocation6] sm:$0xff] %v29_v3  ;;  %32 = vst [vmem:[#allocation6 + $0x8] sm:$0xff] %v30_v4  ;;  %p73_p8 = scmp.ne.s32.totalorder %s40_s24, %s72_s25  ;;  %p78_p10 = scmp.lt.s32.totalorder %s72_s25, %s72_s25 }
  0x17   :  { %p79_p11 = por %p78_p10, %p77_p9 }
  0x19   :  { %p80_p12 = pnand %p79_p11, %p73_p8 }
  0x1b   :  { %83 = shalt.err (!%p80_p12)
}
  0x1c   :  { %s84_s0 = scalar_lea.hbm %s144_s2, 256 }
  0x1d   :  { %p85_p13 = scmp.ne.s32.totalorder %s144_s2, %s84_s0  ;;  %p88_p0 = scmp.lt.u32.totalorder %s84_s0, %s144_s2 }
  0x1f   :  { %p90_p1 = pnand %p88_p0, %p85_p13 }
  0x21   :  { %93 = shalt.err (!%p90_p1)
}
  0x22   :  { %42 = dma.vmem_to_hbm [thread:$0]  %s40_s24, 256, %s144_s2, [#allocation5]  }
  0x23   :  { %96 = dma.done.wait [#allocation5], 256  }
  0x24   :  { %97 = vsyncadd [#allocation5], 4294967040 }
  0x25   :  { %46 = vsyncpa [#allocation4], 1 }
  0x26   :  { %47 = vsyncpa [#allocation5], 1 }

</bundles_post_ra>
